<compile_context>
chip_gen: v7x
topology: tpu7x:2x2x1
jax: 0.10.0
libtpu: 0.0.40
codegen_flags: <defaults>
</compile_context>

<pallas_src>
import jax
import jax.numpy as jnp
from jax.experimental import pallas as pl
from jax.experimental.pallas import tpu as pltpu

K = 10
FEATURE_DIM = K * 3          # 30
H1, H2 = 32, 16
OUT_PI, OUT_VF = 1, 1
NUM_BRANCHES = 2             # policy + value fused into one (30, 2) affine map

TILE_B_MAX = 8192            # rows per grid step (fits comfortably in VMEM
                             # double-buffered on v5e/v6e/v7x)


# --------------------------------------------------------------------------
# Kernel: one fused affine map + tanh per batch tile.
# --------------------------------------------------------------------------
def fused_affine_tanh_kernel(x_ref, w_ref, b_ref, out_ref):
    # x_ref : (TILE_B, 30)   f32   (streamed per grid step)
    # w_ref : (30, 2)        f32   (resident; constant index_map)
    # b_ref : (1, 2)         f32   (resident; constant index_map)
    # out   : (TILE_B, 2)    f32   col 0 = policy, col 1 = value
    y = jnp.dot(x_ref[...], w_ref[...], preferred_element_type=jnp.float32)
    out_ref[...] = jnp.tanh(y + b_ref[...]).astype(out_ref.dtype)


# --------------------------------------------------------------------------
# Parameter folding: three chained Linears == one affine map per branch.
# Weights are stored as (in, out) so y = x @ W + b.
# --------------------------------------------------------------------------
def _fold_params(p):
    def fold(w1, b1, w2, b2, w3, b3):
        wc = w1 @ w2 @ w3                    # (30, 1)
        bc = (b1 @ w2 + b2) @ w3 + b3        # (1, 1)
        return wc, bc

    pw, pb = fold(p["pw1"], p["pb1"], p["pw2"], p["pb2"], p["pw3"], p["pb3"])
    vw, vb = fold(p["vw1"], p["vb1"], p["vw2"], p["vb2"], p["vw3"], p["vb3"])
    w_packed = jnp.concatenate([pw, vw], axis=1)   # (30, 2)
    b_packed = jnp.concatenate([pb, vb], axis=1)   # (1, 2)
    return w_packed, b_packed


# --------------------------------------------------------------------------
# Wrapper.
# --------------------------------------------------------------------------
def custom_network_forward(features, params):
    """features: (B, FEATURE_DIM) f32.  Returns (policy (B,1), value (B,1))."""
    B = features.shape[0]
    w_packed, b_packed = _fold_params(params)

    # Full batch as one block if small (block == full dim is always legal);
    # otherwise 8192-row tiles (multiple of 8 sublanes) with cdiv grid.
    tile_b = B if B <= TILE_B_MAX else TILE_B_MAX
    grid = (pl.cdiv(B, tile_b),)

    fused = pl.pallas_call(
        fused_affine_tanh_kernel,
        out_shape=jax.ShapeDtypeStruct((B, NUM_BRANCHES), jnp.float32),
        grid=grid,
        in_specs=[
            pl.BlockSpec((tile_b, FEATURE_DIM), lambda i: (i, 0)),
            pl.BlockSpec((FEATURE_DIM, NUM_BRANCHES), lambda i: (0, 0)),
            pl.BlockSpec((1, NUM_BRANCHES), lambda i: (0, 0)),
        ],
        out_specs=pl.BlockSpec((tile_b, NUM_BRANCHES), lambda i: (i, 0)),
        compiler_params=pltpu.CompilerParams(
            dimension_semantics=("parallel",),     # shard tiles across TCs (v7x)
            vmem_limit_bytes=32 * 1024 * 1024,
        ),
    )(features, w_packed, b_packed)

    return fused[:, 0:OUT_PI], fused[:, OUT_PI:OUT_PI + OUT_VF]


# --------------------------------------------------------------------------
# Deterministic init mimicking torch.nn.Linear default:
# U(-1/sqrt(fan_in), 1/sqrt(fan_in)) for both W and b; W stored as (in, out).
# --------------------------------------------------------------------------
def init_params(key):
    dims = [(FEATURE_DIM, H1), (H1, H2), (H2, OUT_PI)]
    params = {}
    keys = iter(jax.random.split(key, 12))
    for prefix in ("p", "v"):
        for layer, (fan_in, fan_out) in enumerate(dims, start=1):
            bound = 1.0 / (fan_in ** 0.5)
            params[f"{prefix}w{layer}"] = jax.random.uniform(
                next(keys), (fan_in, fan_out), jnp.float32, -bound, bound)
            params[f"{prefix}b{layer}"] = jax.random.uniform(
                next(keys), (1, fan_out), jnp.float32, -bound, bound)
    return params


# --------------------------------------------------------------------------
# Pure-JAX reference (unfused, layer-by-layer) — also validates the folding.
# --------------------------------------------------------------------------
def reference_forward(features, p):
    def branch(x, w1, b1, w2, b2, w3, b3):
        h = x @ w1 + b1
        h = h @ w2 + b2
        h = h @ w3 + b3
        return jnp.tanh(h)

    pi = branch(features, p["pw1"], p["pb1"], p["pw2"], p["pb2"],
                p["pw3"], p["pb3"])
    vf = branch(features, p["vw1"], p["vb1"], p["vw2"], p["vb2"],
                p["vw3"], p["vb3"])
    return pi, vf


if __name__ == "__main__":
    key = jax.random.PRNGKey(0)
    pkey, xkey = jax.random.split(key)
    params = init_params(pkey)

    B = 8
    features = jax.random.normal(xkey, (B, FEATURE_DIM), jnp.float32)

    pi, vf = custom_network_forward(features, params)
    jax.block_until_ready((pi, vf))

    pi_ref, vf_ref = reference_forward(features, params)
    assert pi.shape == (B, OUT_PI) and vf.shape == (B, OUT_VF)
    assert jnp.allclose(pi, pi_ref, atol=1e-5, rtol=1e-5)
    assert jnp.allclose(vf, vf_ref, atol=1e-5, rtol=1e-5)

    print("KERNEL_OK")
</pallas_src>

<mosaic_0001>
module attributes {stable_mosaic.version = 11 : i64} {
  func.func @fused_affine_tanh_kernel(%arg0: i32, %arg1: memref<8x30xf32, #tpu.memory_space<vmem>>, %arg2: memref<30x2xf32, #tpu.memory_space<vmem>>, %arg3: memref<1x2xf32, #tpu.memory_space<vmem>>, %arg4: memref<8x2xf32, #tpu.memory_space<vmem>>) attributes {dimension_semantics = [#tpu.dimension_semantics<parallel>], iteration_bounds = array<i64: 1>, scalar_prefetch = 0 : i64, scratch_operands = 0 : i64, tpu.core_type = #tpu.core_type<tc>, window_params = [{transform_indices = @transform_0, window_bounds = array<i64: 8, 30>}, {pipeline_mode = #tpu.pipeline_mode<synchronous>, transform_indices = @transform_1, window_bounds = array<i64: 30, 2>}, {pipeline_mode = #tpu.pipeline_mode<synchronous>, transform_indices = @transform_2, window_bounds = array<i64: 1, 2>}, {transform_indices = @transform_3, window_bounds = array<i64: 8, 2>}]} {
    %c0 = arith.constant 0 : index
    %c0_0 = arith.constant 0 : index
    %0 = vector.load %arg1[%c0, %c0_0] : memref<8x30xf32, #tpu.memory_space<vmem>>, vector<8x30xf32>
    %c0_1 = arith.constant 0 : index
    %c0_2 = arith.constant 0 : index
    %1 = vector.load %arg2[%c0_1, %c0_2] : memref<30x2xf32, #tpu.memory_space<vmem>>, vector<30x2xf32>
    %cst = arith.constant dense<0.000000e+00> : vector<8x2xf32>
    %2 = tpu.matmul %0, %1, %cst {dimension_numbers = #tpu.dot_dimension_numbers<[1], [0], [0], [1], [0, 0, 1, 1], [], []>} : vector<8x30xf32>, vector<30x2xf32>, vector<8x2xf32> -> vector<8x2xf32>
    %c0_3 = arith.constant 0 : index
    %c0_4 = arith.constant 0 : index
    %3 = vector.load %arg3[%c0_3, %c0_4] : memref<1x2xf32, #tpu.memory_space<vmem>>, vector<1x2xf32>
    %4 = vector.broadcast %3 : vector<1x2xf32> to vector<8x2xf32>
    %5 = arith.addf %2, %4 : vector<8x2xf32>
    %6 = math.tanh %5 : vector<8x2xf32>
    %c0_5 = arith.constant 0 : index
    %c0_6 = arith.constant 0 : index
    %7 = vector.load %arg4[%c0_5, %c0_6] : memref<8x2xf32, #tpu.memory_space<vmem>>, vector<8x2xf32>
    tpu.vector_store %arg4[%c0_5, %c0_6], %6 {strides = array<i32>} : memref<8x2xf32, #tpu.memory_space<vmem>>, vector<8x2xf32>,
    return
  }
  func.func @transform_0(%arg0: i32) -> (i32, i32) {
    %c0_i32 = arith.constant 0 : i32
    %c0_i32_0 = arith.constant 0 : i32
    return %arg0, %c0_i32 : i32, i32
  }
  func.func @transform_1(%arg0: i32) -> (i32, i32) {
    %c0_i32 = arith.constant 0 : i32
    %c0_i32_0 = arith.constant 0 : i32
    %c0_i32_1 = arith.constant 0 : i32
    return %c0_i32, %c0_i32_0 : i32, i32
  }
  func.func @transform_2(%arg0: i32) -> (i32, i32) {
    %c0_i32 = arith.constant 0 : i32
    %c0_i32_0 = arith.constant 0 : i32
    %c0_i32_1 = arith.constant 0 : i32
    return %c0_i32, %c0_i32_0 : i32, i32
  }
  func.func @transform_3(%arg0: i32) -> (i32, i32) {
    %c0_i32 = arith.constant 0 : i32
    %c0_i32_0 = arith.constant 0 : i32
    return %arg0, %c0_i32 : i32, i32
  }
}

</mosaic_0001>

<bundles_post_ra>
// kernel: tpu_custom_call.1
= control target key start
LH: loop header
LB: loop body
LE: loop exit
PB: predicated region body
PF: predicated region fallthrough
CT: control target
= control target key end

     0   :  { %v143_v0 = vmov 0.0|0.0   ;;  %vm30_vm0 = vcmask 1045504   ;;  %vm144_vm1 = vmmov 0   ;;  %v145_v6 = vmov 0.0   ;;  %s188_s1 = inlined_call_operand.vmem [shape: f32[30,2], index: 1, kind: input, shape index: {}]   ;;  %s189_s0 = inlined_call_operand.vmem [shape: f32[8,30], index: 0, kind: input, shape index: {}]   ;;  %s190_s2 = inlined_call_operand.vmem [shape: f32[1,2], index: 2, kind: input, shape index: {}]   ;;  %s191_s3 = inlined_call_operand.vmem [shape: f32[8,2], index: 3, kind: output, shape index: {}]  }
   0x1   :  { %130 = vmatprep.subr.bf16.mxu0 %v143_v0  ;;  %v15_v1 = vld [vmem:[%s188_s1] sm:$0xff]  ;;  %v16_v2 = vld [vmem:[%s188_s1 + $0x8] sm:$0xff]  ;;  %v17_v3 = vld [vmem:[%s188_s1 + $0x10] sm:$0xff]  ;;  %127 = vmatprep.mubr.msk.f32.mxu0 %vm144_vm1, %v145_v6  ;;  %vm146_vm2 = vmmov 1   ;;  %vm26_vm4 = vcmask 244736   ;;  %vm105_vm5 = vcmask 15360  }
   0x2   :  { %v131_v4 = vpack.c.bf16 %v16_v2, %v15_v1  ;;  %v18_v5 = vld [vmem:[%s188_s1 + $0x18] sm:$0x3f]  ;;  %vm135_vm3 = vmpackc.low %vm30_vm0, %vm146_vm2  ;;  %v14_v8 = vld [vmem:[%s189_s0] sm:$0xff] }
   0x3   :  { %v134_v7 = vpack.c.bf16 %v18_v5, %v17_v3  ;;  %v111_v9 = vld [vmem:[%s190_s2] ss:$0 sm:$0xff] }
   0x4   :  { %132 = vmatpush3.bf16.msra.mxu0 %v131_v4 }
   0x5   :  { %133 = vmatprep.subr.bf16.mxu0 %v143_v0 }
   0x8   :  { %136 = vmatpush3.bf16.msk.msra.mxu0 %vm135_vm3, %v134_v7 }
   0xb   :  { %128 = vmatmul.mubr.msk.f32.vlgmr.msra.gmra.mrb[0].mxu0 %vm26_vm4, %v14_v8 }
  0xde   :  { %v100_v10 = vpop.f32.mrb[0].mxu0 }
  0xdf   :  { %v101_v11 = vadd.f32 %v111_v9, %v100_v10  ;;  %v129_v12 = vpop.f32.mrb[1].mxu0 }
  0xe1   :  { %141 = vtanh.f32 %v101_v11 }
  0xeb   :  { %v142_v13 = vpop.eup %141 }
  0xec   :  { %106 = vst.msk [vmem:[%s191_s3] sm:$0xff] %vm105_vm5, %v142_v13 }

</bundles_post_ra>
